<compile_context>
chip_gen: v6e
topology: v6e:2x2x1
jax: 0.10.0
libtpu: 0.0.40
codegen_flags: <defaults>
</compile_context>

<pallas_src>
import functools

import jax
import jax.numpy as jnp
from jax.experimental import pallas as pl
from jax.experimental.pallas import tpu as pltpu


def _round_up(x, m):
    return ((x + m - 1) // m) * m


def _cdiv(a, b):
    return -(-a // b)


def _vmem_capacity_bytes():
    try:
        return int(pltpu.get_tpu_info().vmem_capacity_bytes)
    except Exception:
        return 64 << 20  # conservative fallback (v7x-sized)


def _kn_tile_caps():
    # Bigger resident weight tiles on 128-MiB-VMEM parts (v5e/v6e);
    # keep v7x (64 MiB) safe.
    if _vmem_capacity_bytes() >= (96 << 20):
        return 4096, 2048
    return 2048, 1024


def _pick_kn_tiles(K, N, max_tk, max_tn):
    """Tiles / padded extents that depend only on (hidden, out)."""
    # Prefer 256-multiples: the v6e/v7x MXU is 2x256x256, 128-odd widths idle
    # half the systolic array.  Tiny dims just round to the 128-lane minimum.
    kp = _round_up(K, 256 if K > 128 else 128)
    if kp <= max_tk:
        tk, Kp = kp, kp                       # whole contraction in one tile
    else:
        tk = 512
        Kp = _round_up(K, tk)
    np_ = _round_up(N, 256 if N > 128 else 128)
    if np_ <= max_tn:
        tn, Np = np_, np_                     # weight N-block stays resident
    else:
        tn = 512
        Np = _round_up(N, tn)
    return tk, tn, Kp, Np


def _pick_tm(M):
    if M <= 16:
        return 16                              # single tiny (bf16-native) block
    if M <= 1024:
        # >= 2 M blocks so both TensorCores (v7x megacore) get work, while
        # keeping M-padding small (16-row granularity, not 256).
        return _round_up(_cdiv(M, 2), 16)
    return 512


def _index_maps(n_outer, multi_k):
    """(x_map, w_map, o_map) for the chosen grid-axis order."""
    if multi_k:
        if n_outer:
            return (lambda j, i, k: (i, k),
                    lambda j, i, k: (k, j),
                    lambda j, i, k: (i, j))
        return (lambda i, j, k: (i, k),
                lambda i, j, k: (k, j),
                lambda i, j, k: (i, j))
    if n_outer:
        return (lambda j, i: (i, 0),
                lambda j, i: (0, j),
                lambda j, i: (i, j))
    return (lambda i, j: (i, 0),
            lambda i, j: (0, j),
            lambda i, j: (i, j))


def _single_k_kernel(x_ref, w_ref, o_ref, *, compute_dtype):
    # Whole contraction in one shot: no accumulator scratch, no init/finalize.
    # The x cast runs on the VPU and hides under MXU/DMA slack.
    x = x_ref[...].astype(compute_dtype)
    o_ref[...] = jnp.dot(
        x, w_ref[...], preferred_element_type=jnp.float32
    ).astype(o_ref.dtype)


def _multi_k_kernel(x_ref, w_ref, o_ref, acc_ref, *, compute_dtype):
    # General K-tiled path (only used when hidden doesn't fit one tile).
    @pl.when(pl.program_id(2) == 0)
    def _():
        acc_ref[...] = jnp.zeros_like(acc_ref)

    acc_ref[...] += jnp.dot(
        x_ref[...].astype(compute_dtype), w_ref[...],
        preferred_element_type=jnp.float32,
    )

    @pl.when(pl.program_id(2) == pl.num_programs(2) - 1)
    def _():
        o_ref[...] = acc_ref[...].astype(o_ref.dtype)


@functools.partial(
    jax.jit,
    static_argnames=("n", "tm", "tk", "tn", "compute_dtype", "out_dtype"),
)
def itc_head_forward(x, w_padded, *, n, tk, tn, tm=None,
                     compute_dtype=jnp.bfloat16, out_dtype=None):
    """x: [M, hidden] activations (original dtype, cast happens in-kernel).
       w_padded: [Kp, Np] pre-transposed / pre-cast / pre-padded weight."""
    M, K = x.shape
    Kp, Np = w_padded.shape
    assert Kp >= K and Np >= n, "padded weight smaller than logical extents"
    assert Kp % tk == 0 and Np % tn == 0, "padded weight not a tile multiple"
    out_dtype = out_dtype or x.dtype

    if tm is None:
        tm = _pick_tm(M)
    assert tm % 16 == 0 and tk % 128 == 0 and tn % 128 == 0, (
        f"tiles must be (16,128)-aligned, got tm={tm}, tk={tk}, tn={tn}")

    Mp = _round_up(M, tm)
    gm, gn, gk = Mp // tm, Np // tn, Kp // tk

    # Pad x only when required (K and/or M not tile multiples), in its
    # original dtype; padded rows/cols of x and W are zero -> no effect.
    xk = x
    if (Mp, Kp) != (M, K):
        xk = jnp.pad(x, ((0, Mp - M), (0, Kp - K)))

    xb = jnp.dtype(x.dtype).itemsize
    wb = jnp.dtype(w_padded.dtype).itemsize
    ob = jnp.dtype(out_dtype).itemsize

    # VMEM budget: double-buffered inputs + double-buffered output (+acc).
    working = 2 * (tm * tk * xb + tk * tn * wb) + 2 * tm * tn * ob
    if gk > 1:
        working += tm * tn * 4
    budget = int(_vmem_capacity_bytes() * 0.72)
    if working > budget:
        raise ValueError(
            f"tile working set {working >> 20} MiB exceeds VMEM budget "
            f"{budget >> 20} MiB on this TPU; shrink tm/tk/tn")
    vmem_limit = min(max(int(working * 1.3) + (2 << 20), 16 << 20), budget)

    # Choose grid-axis order: keep the operand whose re-streaming would cost
    # more HBM bytes resident (constant block index on the inner axis).
    cost_m_outer = gm * Kp * Np * wb + Mp * Kp * xb   # W re-streamed gm times
    cost_n_outer = gn * Mp * Kp * xb + Kp * Np * wb   # x re-streamed gn times
    n_outer = cost_n_outer < cost_m_outer

    x_map, w_map, o_map = _index_maps(n_outer, gk > 1)
    grid = ((gn, gm) if n_outer else (gm, gn)) + ((gk,) if gk > 1 else ())
    semantics = ("parallel", "parallel") + (("arbitrary",) if gk > 1 else ())
    scratch = [pltpu.VMEM((tm, tn), jnp.float32)] if gk > 1 else []

    if gk == 1:
        kern = functools.partial(_single_k_kernel, compute_dtype=compute_dtype)
    else:
        kern = functools.partial(_multi_k_kernel, compute_dtype=compute_dtype)

    cost = pl.CostEstimate(
        flops=2 * Mp * Kp * Np,
        transcendentals=0,
        bytes_accessed=Mp * Kp * xb + Kp * Np * wb + Mp * Np * ob,
    )

    out_padded = pl.pallas_call(
        kern,
        out_shape=jax.ShapeDtypeStruct((Mp, Np), out_dtype),
        grid_spec=pltpu.PrefetchScalarGridSpec(
            num_scalar_prefetch=0,
            grid=grid,
            in_specs=[
                pl.BlockSpec((tm, tk), x_map),
                pl.BlockSpec((tk, tn), w_map),
            ],
            out_specs=pl.BlockSpec((tm, tn), o_map),
            scratch_shapes=scratch,
        ),
        compiler_params=pltpu.CompilerParams(
            dimension_semantics=semantics,
            vmem_limit_bytes=vmem_limit,
        ),
        cost_estimate=cost,
    )(xk, w_padded)

    if (Mp, Np) != (M, n):
        return out_padded[:M, :n]
    return out_padded


class ITCHeadPallas:
    """JAX/Pallas equivalent of the PyTorch ITCHead module (Linear, no bias)."""

    def __init__(self, hidden_size, out_size, key,
                 compute_dtype=jnp.bfloat16, out_dtype=None):
        # nn.Linear default init: U(-1/sqrt(hidden), 1/sqrt(hidden)),
        # weight shape [out_size, hidden_size].
        bound = 1.0 / (hidden_size ** 0.5)
        self.weight = jax.random.uniform(
            key, (out_size, hidden_size), minval=-bound, maxval=bound,
            dtype=jnp.float32,
        )
        self.hidden_size = hidden_size
        self.out_size = out_size
        self.compute_dtype = compute_dtype
        self.out_dtype = out_dtype

        # (K, N)-dependent tile choices + weight transpose/cast/pad: ONCE,
        # so the jitted forward never touches W beyond the kernel's own DMA.
        max_tk, max_tn = _kn_tile_caps()
        self.tk, self.tn, kp, np_ = _pick_kn_tiles(
            hidden_size, out_size, max_tk, max_tn)
        w_t = jnp.asarray(self.weight.T, dtype=compute_dtype)   # [K, N]
        if (kp, np_) != (hidden_size, out_size):
            w_t = jnp.pad(w_t, ((0, kp - hidden_size), (0, np_ - out_size)))
        self.weight_t_padded = w_t

    def __call__(self, x):
        # Accept [..., hidden]; flatten leading dims, matmul, restore.
        orig_shape = x.shape
        x2d = x.reshape(-1, orig_shape[-1])
        y2d = itc_head_forward(
            x2d, self.weight_t_padded,
            n=self.out_size, tk=self.tk, tn=self.tn,
            compute_dtype=self.compute_dtype, out_dtype=self.out_dtype,
        )
        return y2d.reshape(*orig_shape[:-1], self.out_size)


if __name__ == "__main__":
    key = jax.random.PRNGKey(0)
    k_w, k_x = jax.random.split(key)

    batch, hidden_size, out_size = 8, 32, 64

    head = ITCHeadPallas(hidden_size, out_size, k_w)
    x = jax.random.normal(k_x, (batch, hidden_size), dtype=jnp.float32)

    y = jax.block_until_ready(head(x))
    assert y.shape == (batch, out_size)

    # Reference with the same bf16-operand / f32-accumulate recipe.
    y_ref = jnp.dot(
        x.astype(jnp.bfloat16), head.weight.T.astype(jnp.bfloat16),
        preferred_element_type=jnp.float32,
    ).astype(x.dtype)
    assert jnp.allclose(y, y_ref, atol=1e-3, rtol=1e-3), float(
        jnp.max(jnp.abs(y - y_ref)))

    # Sanity check against full-precision PyTorch semantics (x @ W.T).
    y_f32 = x @ head.weight.T
    assert jnp.allclose(y, y_f32, atol=5e-2, rtol=5e-2)

    print("KERNEL_OK")
</pallas_src>

<mosaic_0001>
module attributes {stable_mosaic.version = 11 : i64} {
  func.func @_single_k_kernel(%arg0: i32, %arg1: i32, %arg2: memref<16x128xf32, #tpu.memory_space<vmem>>, %arg3: memref<128x128xbf16, #tpu.memory_space<vmem>>, %arg4: memref<16x128xf32, #tpu.memory_space<vmem>>) attributes {dimension_semantics = [#tpu.dimension_semantics<parallel>, #tpu.dimension_semantics<parallel>], iteration_bounds = array<i64: 1, 1>, scalar_prefetch = 0 : i64, scratch_operands = 0 : i64, tpu.core_type = #tpu.core_type<tc>, window_params = [{transform_indices = @transform_0, window_bounds = array<i64: 16, 128>}, {transform_indices = @transform_1, window_bounds = array<i64: 128, 128>}, {transform_indices = @transform_2, window_bounds = array<i64: 16, 128>}]} {
    %c0 = arith.constant 0 : index
    %c0_0 = arith.constant 0 : index
    %0 = vector.load %arg2[%c0, %c0_0] : memref<16x128xf32, #tpu.memory_space<vmem>>, vector<16x128xf32>
    %1 = arith.truncf %0 : vector<16x128xf32> to vector<16x128xbf16>
    %c0_1 = arith.constant 0 : index
    %c0_2 = arith.constant 0 : index
    %2 = vector.load %arg3[%c0_1, %c0_2] : memref<128x128xbf16, #tpu.memory_space<vmem>>, vector<128x128xbf16>
    %cst = arith.constant dense<0.000000e+00> : vector<16x128xf32>
    %3 = tpu.matmul %1, %2, %cst {dimension_numbers = #tpu.dot_dimension_numbers<[1], [0], [0], [1], [0, 0, 1, 1], [], []>} : vector<16x128xbf16>, vector<128x128xbf16>, vector<16x128xf32> -> vector<16x128xf32>
    %c0_3 = arith.constant 0 : index
    %c0_4 = arith.constant 0 : index
    %4 = vector.load %arg4[%c0_3, %c0_4] : memref<16x128xf32, #tpu.memory_space<vmem>>, vector<16x128xf32>
    tpu.vector_store %arg4[%c0_3, %c0_4], %3 {strides = array<i32>} : memref<16x128xf32, #tpu.memory_space<vmem>>, vector<16x128xf32>,
    return
  }
  func.func @transform_0(%arg0: i32, %arg1: i32) -> (i32, i32) {
    %c0_i32 = arith.constant 0 : i32
    %c0_i32_0 = arith.constant 0 : i32
    return %arg0, %c0_i32 : i32, i32
  }
  func.func @transform_1(%arg0: i32, %arg1: i32) -> (i32, i32) {
    %c0_i32 = arith.constant 0 : i32
    %c0_i32_0 = arith.constant 0 : i32
    return %c0_i32, %arg1 : i32, i32
  }
  func.func @transform_2(%arg0: i32, %arg1: i32) -> (i32, i32) {
    %c0_i32 = arith.constant 0 : i32
    return %arg0, %arg1 : i32, i32
  }
}

</mosaic_0001>

<bundles_post_ra>
// kernel: itc_head_forward.1
= control target key start
LH: loop header
LB: loop body
LE: loop exit
PB: predicated region body
PF: predicated region fallthrough
CT: control target
= control target key end

     0   :  { %7 = vsyncpa [#allocation3], 0  ;;  %s213_s9 = smov [#allocation2]   ;;  %s248_s0 = inlined_call_operand.vmem [shape: f32[16,128], index: 0, kind: input, shape index: {}]   ;;  %s249_s1 = inlined_call_operand.hbm [shape: bf16[128,128], index: 1, kind: input, shape index: {}]   ;;  %s250_s2 = inlined_call_operand.vmem [shape: f32[16,128], index: 2, kind: output, shape index: {}]  }
   0x1   :  { %s15_s10 = sshll.u32 %s213_s9, 4  ;;  %s16_s10 = int_to_ptr.vmem [resolvable:$true] %s15_s10 }
   0x2   :  { %s199_s11 = scalar_lea.vmem %s16_s10, 1024  ;;  %p204_p1 = scmp.lt.s32.totalorder %s16_s10, %s16_s10 }
   0x3   :  { %p200_p0 = scmp.ne.s32.totalorder %s16_s10, %s199_s11  ;;  %p205_p2 = scmp.lt.s32.totalorder %s199_s11, %s199_s11 }
   0x5   :  { %p206_p3 = por %p205_p2, %p204_p1 }
   0x7   :  { %p207_p4 = pnand %p206_p3, %p200_p0 }
   0x9   :  { %210 = shalt.err (!%p207_p4)
}
   0xa   :  { %s214_s12 = smov 64   ;;  %s215_s13 = smov 4  }
   0xb   :  { %21 = dma.hbm_to_vmem [thread:$0]  %s249_s1, 1024, %s16_s10, [#allocation3], %s214_s12, %s214_s12, %s215_s13  }
   0xc   :  { %211 = dma.done.wait [#allocation3], 1024  }
   0xd   :  { %212 = vsyncadd [#allocation3], 4294966272  ;;  %v216_v0 = vmov 0.0   ;;  %vm217_vm0 = vmmov 0   ;;  %v183_v1 = vld [vmem:[#allocation2 + $0x38] sm:$0xff]   ;;  %v184_v2 = vld [vmem:[#allocation2 + $0x30] sm:$0xff]  }
   0xe   :  { %158 = vmatprep.subr.bf16.mxu0 %v216_v0  ;;  %174 = vmatprep.mubr.msk.bf16.mxu0 %vm217_vm0, %v216_v0  ;;  %v185_v3 = vld [vmem:[#allocation2 + $0x28] sm:$0xff]   ;;  %v186_v4 = vld [vmem:[#allocation2 + $0x20] sm:$0xff]   ;;  %v187_v5 = vld [vmem:[#allocation2 + $0x18] sm:$0xff]  }
   0xf   :  { %159 = vmatpush3.bf16.msra.mxu0 %v183_v1  ;;  %v188_v6 = vld [vmem:[#allocation2 + $0x10] sm:$0xff]   ;;  %v189_v7 = vld [vmem:[#allocation2 + $0x8] sm:$0xff]   ;;  %v190_v8 = vld [vmem:[#allocation2] sm:$0xff]  }
  0x10   :  { %160 = vmatprep.subr.bf16.mxu0 %v216_v0  ;;  %v26_v9 = vld [vmem:[%s248_s0] sm:$0xff]  ;;  %v27_v10 = vld [vmem:[%s248_s0 + $0x8] sm:$0xff] }
  0x11   :  { %v28_v11 = vpack.c.bf16 %v27_v10, %v26_v9 }
  0x13   :  { %161 = vmatpush3.bf16.msra.mxu0 %v184_v2 }
  0x14   :  { %162 = vmatprep.subr.bf16.mxu0 %v216_v0 }
  0x17   :  { %163 = vmatpush3.bf16.msra.mxu0 %v185_v3 }
  0x18   :  { %164 = vmatprep.subr.bf16.mxu0 %v216_v0 }
  0x1b   :  { %165 = vmatpush3.bf16.msra.mxu0 %v186_v4 }
  0x1c   :  { %166 = vmatprep.subr.bf16.mxu0 %v216_v0 }
  0x1f   :  { %167 = vmatpush3.bf16.msra.mxu0 %v187_v5 }
  0x20   :  { %168 = vmatprep.subr.bf16.mxu0 %v216_v0 }
  0x23   :  { %169 = vmatpush3.bf16.msra.mxu0 %v188_v6 }
  0x24   :  { %170 = vmatprep.subr.bf16.mxu0 %v216_v0 }
  0x27   :  { %171 = vmatpush3.bf16.msra.mxu0 %v189_v7 }
  0x28   :  { %172 = vmatprep.subr.bf16.mxu0 %v216_v0 }
  0x2b   :  { %173 = vmatpush3.bf16.msra.mxu0 %v190_v8 }
  0x2e   :  { %175 = vmatmul.mubr.bf16.vlgmr.msra.gmra.mxu0 %v28_v11 }
  0xee   :  { %v127_v12 = vpop.f32.mrf.mxu0 }
  0xef   :  { %134 = vst [vmem:[%s250_s2] sm:$0xff] %v127_v12 }
  0xf0   :  { %v176_v13 = vpop.f32.mrf.mxu0 }
  0xf2   :  { %v130_v14 = vpop.f32.mrf.mxu0 }
  0xf3   :  { %135 = vst [vmem:[%s250_s2 + $0x8] sm:$0xff] %v130_v14 }
  0xf4   :  { %v177_v15 = vpop.f32.mrf.mxu0 }
  0xf5   :  { %140 = vsyncpa [#allocation3], 1 }

</bundles_post_ra>
